<compile_context>
chip_gen: v6e
topology: v6e:2x2x1
jax: 0.10.0
libtpu: 0.0.40
codegen_flags: <defaults>
</compile_context>

<pallas_src>
import functools

import jax
import jax.numpy as jnp
from jax.experimental import pallas as pl
from jax.experimental.pallas import tpu as pltpu

BLOCK_MUL = 2  # ResNeXt bottleneck expansion

# Tile sizes (multiples of (8, 128); modest enough for v7x's 64 MiB VMEM).
_TM, _TN, _TK = 256, 256, 512
_TBM = 1024                      # row tile for memory-bound elementwise/BN
_VMEM_LIMIT = 48 * 1024 * 1024   # above every generation's default scoped limit


def _round_up(x, m):
    return (x + m - 1) // m * m


# ----------------------------- Pallas kernels -----------------------------

def matmul_bias_kernel(x_ref, w_ref, b_ref, o_ref, acc_ref):
    # x: (1, tm, tk) bf16, w: (1, tk, tn) bf16, b: (1, 1, tn) f32,
    # o: (1, tm, tn) f32, acc: (tm, tn) f32 scratch.  K is grid axis 3.
    @pl.when(pl.program_id(3) == 0)
    def _():
        acc_ref[...] = jnp.zeros_like(acc_ref)

    acc_ref[...] += jnp.dot(x_ref[0], w_ref[0],
                            preferred_element_type=jnp.float32)

    @pl.when(pl.program_id(3) == pl.num_programs(3) - 1)
    def _():
        o_ref[0] = acc_ref[...] + b_ref[0]


def bn_stats_kernel(x_ref, sum_ref, sq_ref):
    # Row-tiled reduction: accumulate per-channel sum and sum-of-squares into
    # a resident (1, C) output block over the "arbitrary" row-tile grid axis.
    @pl.when(pl.program_id(0) == 0)
    def _():
        sum_ref[...] = jnp.zeros_like(sum_ref)
        sq_ref[...] = jnp.zeros_like(sq_ref)

    x = x_ref[...]
    sum_ref[...] += jnp.sum(x, axis=0, keepdims=True)
    sq_ref[...] += jnp.sum(x * x, axis=0, keepdims=True)


def bn_apply_kernel(x_ref, sum_ref, sq_ref, g_ref, b_ref, o_ref, *,
                    count, eps, relu):
    mean = sum_ref[...] * (1.0 / count)
    var = jnp.maximum(sq_ref[...] * (1.0 / count) - mean * mean, 0.0)
    scale = g_ref[...] * jax.lax.rsqrt(var + eps)
    shift = b_ref[...] - mean * scale
    y = x_ref[...] * scale + shift
    if relu:
        y = jnp.maximum(y, 0.0)
    o_ref[...] = y


def bn_apply_res_kernel(x_ref, r_ref, sum_ref, sq_ref, g_ref, b_ref, o_ref, *,
                        count, eps, relu):
    # BN apply fused with residual add (+ReLU): relu(bn(x) + residual).
    mean = sum_ref[...] * (1.0 / count)
    var = jnp.maximum(sq_ref[...] * (1.0 / count) - mean * mean, 0.0)
    scale = g_ref[...] * jax.lax.rsqrt(var + eps)
    shift = b_ref[...] - mean * scale
    y = x_ref[...] * scale + shift + r_ref[...]
    if relu:
        y = jnp.maximum(y, 0.0)
    o_ref[...] = y


def maxpool_kernel(d_ref, o_ref, *, hout, wout):
    # d_ref: (1, 4, Hh, Wh, C) parity planes; plane p=2a+b holds
    # xp[2i+a, 2j+b].  3x3/stride-2 max pool = max over 9 unstrided shifts.
    m = None
    for kh in range(3):
        a, di = kh % 2, kh // 2
        for kw in range(3):
            b, dj = kw % 2, kw // 2
            t = d_ref[0, 2 * a + b, di:di + hout, dj:dj + wout, :]
            m = t if m is None else jnp.maximum(m, t)
    o_ref[0] = m


def avgpool_linear_kernel(x_ref, w_ref, b_ref, o_ref):
    # x: (1, H*W, C) -> global average pool -> linear.  Per-image grid step.
    pooled = jnp.mean(x_ref[0], axis=0, keepdims=True)        # (1, C)
    o_ref[0] = jnp.dot(pooled, w_ref[...],
                       preferred_element_type=jnp.float32) + b_ref[...]


# ------------------------------ pallas_call glue ------------------------------

def pallas_grouped_matmul_bias(x, w, b):
    """x: (G, M, K) bf16, w: (G, K, N) bf16, b: (G, N) f32 -> (G, M, N) f32."""
    G, M, K = x.shape
    N = w.shape[2]
    tm = min(_TM, _round_up(M, 8))
    tk = min(_TK, _round_up(K, 128))
    tn = min(_TN, _round_up(N, 128))
    Mp, Kp, Np = _round_up(M, tm), _round_up(K, tk), _round_up(N, tn)
    x = jnp.pad(x, ((0, 0), (0, Mp - M), (0, Kp - K)))
    w = jnp.pad(w, ((0, 0), (0, Kp - K), (0, Np - N)))
    b = jnp.pad(b, ((0, 0), (0, Np - N))).reshape(G, 1, Np).astype(jnp.float32)

    grid = (G, Mp // tm, Np // tn, Kp // tk)
    flops = int(2 * G * Mp * Np * Kp)
    bytes_acc = int(2 * G * (Mp * Kp + Kp * Np) + 4 * G * (Mp * Np + Np))

    out = pl.pallas_call(
        matmul_bias_kernel,
        out_shape=jax.ShapeDtypeStruct((G, Mp, Np), jnp.float32),
        grid=grid,
        in_specs=[
            pl.BlockSpec((1, tm, tk), lambda g, i, j, k: (g, i, k)),
            pl.BlockSpec((1, tk, tn), lambda g, i, j, k: (g, k, j)),
            pl.BlockSpec((1, 1, tn), lambda g, i, j, k: (g, 0, j)),
        ],
        out_specs=pl.BlockSpec((1, tm, tn), lambda g, i, j, k: (g, i, j)),
        scratch_shapes=[pltpu.VMEM((tm, tn), jnp.float32)],
        compiler_params=pltpu.CompilerParams(
            dimension_semantics=("parallel", "parallel", "parallel",
                                 "arbitrary"),
            vmem_limit_bytes=_VMEM_LIMIT),
        cost_estimate=pl.CostEstimate(flops=flops, transcendentals=0,
                                      bytes_accessed=bytes_acc),
    )(x, w, b)
    return out[:, :M, :N]


def conv2d_pallas(x, w, b, stride, padding, groups=1):
    """x: (N,H,W,Cin) NHWC f32; w: (Cout, Cin//groups, K, K) (PyTorch order)."""
    N, H, W, Cin = x.shape
    Cout, Cin_g, K, _ = w.shape
    G = groups
    Cout_g = Cout // G
    Hout = (H + 2 * padding - K) // stride + 1
    Wout = (W + 2 * padding - K) // stride + 1
    M = N * Hout * Wout

    x = x.astype(jnp.bfloat16)
    xp = x if padding == 0 else jnp.pad(
        x, ((0, 0), (padding, padding), (padding, padding), (0, 0)))

    # TODO(synk): fold the K*K tap windowing into the matmul grid (index_map
    # offsets over the padded input) instead of materializing im2col patches.
    if K == 1:
        pat = xp[:, ::stride, ::stride, :].reshape(N, Hout, Wout, 1, Cin)
    else:
        cols = [xp[:, kh:kh + stride * Hout:stride,
                   kw:kw + stride * Wout:stride, :]
                for kh in range(K) for kw in range(K)]
        pat = jnp.stack(cols, axis=3)                  # (N, Ho, Wo, K*K, Cin)

    if G == 1:
        pat_g = pat.reshape(1, M, K * K * Cin)
    else:
        pat = pat.reshape(N, Hout, Wout, K * K, G, Cin_g)
        pat_g = pat.transpose(4, 0, 1, 2, 3, 5).reshape(G, M, K * K * Cin_g)

    w_g = (w.reshape(G, Cout_g, Cin_g, K, K)
            .transpose(0, 3, 4, 2, 1)                  # (G, K, K, Cin_g, Cout_g)
            .reshape(G, K * K * Cin_g, Cout_g)
            .astype(jnp.bfloat16))
    if b is None:
        b_g = jnp.zeros((G, Cout_g), jnp.float32)
    else:
        b_g = b.reshape(G, Cout_g).astype(jnp.float32)

    y = pallas_grouped_matmul_bias(pat_g, w_g, b_g)    # (G, M, Cout_g)
    y = jnp.transpose(y, (1, 0, 2)).reshape(N, Hout, Wout, Cout)
    return y


def pallas_batchnorm(x, gamma, beta, relu, residual=None, eps=1e-5):
    """Training-mode batch norm over (N,H,W); optional fused residual+ReLU."""
    N, H, W, C = x.shape
    M = N * H * W
    tbm = min(_TBM, _round_up(M, 8))
    Mp = _round_up(M, tbm)
    x2 = jnp.pad(x.reshape(M, C), ((0, Mp - M), (0, 0)))  # zero rows: harmless

    row_spec = pl.BlockSpec((tbm, C), lambda i: (i, 0))
    vec_spec = pl.BlockSpec((1, C), lambda i: (0, 0))

    s_sum, s_sq = pl.pallas_call(
        bn_stats_kernel,
        out_shape=(jax.ShapeDtypeStruct((1, C), jnp.float32),
                   jax.ShapeDtypeStruct((1, C), jnp.float32)),
        grid=(Mp // tbm,),
        in_specs=[row_spec],
        out_specs=(vec_spec, vec_spec),
        compiler_params=pltpu.CompilerParams(
            dimension_semantics=("arbitrary",), vmem_limit_bytes=_VMEM_LIMIT),
    )(x2)

    g2 = gamma.reshape(1, C).astype(jnp.float32)
    b2 = beta.reshape(1, C).astype(jnp.float32)

    if residual is None:
        kern = functools.partial(bn_apply_kernel, count=float(M), eps=eps,
                                 relu=relu)
        args = (x2, s_sum, s_sq, g2, b2)
        in_specs = [row_spec, vec_spec, vec_spec, vec_spec, vec_spec]
    else:
        r2 = jnp.pad(residual.reshape(M, C), ((0, Mp - M), (0, 0)))
        kern = functools.partial(bn_apply_res_kernel, count=float(M), eps=eps,
                                 relu=relu)
        args = (x2, r2, s_sum, s_sq, g2, b2)
        in_specs = [row_spec, row_spec, vec_spec, vec_spec, vec_spec, vec_spec]

    y = pl.pallas_call(
        kern,
        out_shape=jax.ShapeDtypeStruct((Mp, C), jnp.float32),
        grid=(Mp // tbm,),
        in_specs=in_specs,
        out_specs=row_spec,
        compiler_params=pltpu.CompilerParams(
            dimension_semantics=("parallel",), vmem_limit_bytes=_VMEM_LIMIT),
    )(*args)
    return y[:M].reshape(N, H, W, C)


def maxpool_pallas(x, K=3, stride=2, padding=1):
    assert K == 3 and stride == 2, "specialized 3x3/stride-2 max pool"
    N, H, W, C = x.shape
    Hout = (H + 2 * padding - K) // stride + 1
    Wout = (W + 2 * padding - K) // stride + 1
    Hh, Wh = Hout + 1, Wout + 1
    neg = jnp.finfo(jnp.float32).min
    pad_h = 2 * Hh - H - padding
    pad_w = 2 * Wh - W - padding
    xp = jnp.pad(x, ((0, 0), (padding, pad_h), (padding, pad_w), (0, 0)),
                 constant_values=neg)
    # Space-to-depth parity planes (1x data, no K*K tap stack in HBM).
    d = (xp.reshape(N, Hh, 2, Wh, 2, C)
           .transpose(0, 2, 4, 1, 3, 5)
           .reshape(N, 4, Hh, Wh, C))
    kern = functools.partial(maxpool_kernel, hout=Hout, wout=Wout)
    return pl.pallas_call(
        kern,
        out_shape=jax.ShapeDtypeStruct((N, Hout, Wout, C), jnp.float32),
        grid=(N,),
        in_specs=[pl.BlockSpec((1, 4, Hh, Wh, C),
                               lambda n: (n, 0, 0, 0, 0))],
        out_specs=pl.BlockSpec((1, Hout, Wout, C), lambda n: (n, 0, 0, 0)),
        compiler_params=pltpu.CompilerParams(
            dimension_semantics=("parallel",), vmem_limit_bytes=_VMEM_LIMIT),
    )(d)


def avgpool_linear_pallas(x, w, b):
    N, H, W, C = x.shape
    nc = w.shape[1]
    x3 = x.reshape(N, H * W, C)
    y = pl.pallas_call(
        avgpool_linear_kernel,
        out_shape=jax.ShapeDtypeStruct((N, 1, nc), jnp.float32),
        grid=(N,),
        in_specs=[pl.BlockSpec((1, H * W, C), lambda n: (n, 0, 0)),
                  pl.BlockSpec((C, nc), lambda n: (0, 0)),
                  pl.BlockSpec((1, nc), lambda n: (0, 0))],
        out_specs=pl.BlockSpec((1, 1, nc), lambda n: (n, 0, 0)),
        compiler_params=pltpu.CompilerParams(
            dimension_semantics=("parallel",), vmem_limit_bytes=_VMEM_LIMIT),
    )(x3, w.astype(jnp.float32), b.reshape(1, nc).astype(jnp.float32))
    return y.reshape(N, nc)


# ------------------------------ parameters ------------------------------

def _init_conv(key, cout, cin, k, bias, scale=0.05):
    kw, kb = jax.random.split(key)
    w = jax.random.normal(kw, (cout, cin, k, k), jnp.float32) * scale
    b = jax.random.normal(kb, (cout,), jnp.float32) * scale if bias else None
    return w, b


def _init_bn(key, c):
    kg, kb = jax.random.split(key)
    gamma = 1.0 + 0.1 * jax.random.normal(kg, (c,), jnp.float32)
    beta = 0.1 * jax.random.normal(kb, (c,), jnp.float32)
    return gamma, beta


def _init_block(key, in_planes, gcw, cardinality, stride):
    keys = jax.random.split(key, 8)
    out_planes = BLOCK_MUL * gcw
    p = {"stride": stride, "cardinality": cardinality}
    p["conv1_w"], _ = _init_conv(keys[0], gcw, in_planes, 1, bias=False)
    p["bn1"] = _init_bn(keys[1], gcw)
    p["conv2_w"], _ = _init_conv(keys[2], gcw, gcw // cardinality, 3, bias=False)
    p["bn2"] = _init_bn(keys[3], gcw)
    p["conv3_w"], _ = _init_conv(keys[4], out_planes, gcw, 1, bias=False)
    p["bn3"] = _init_bn(keys[5], out_planes)
    p["has_shortcut"] = (stride != 1) or (in_planes != out_planes)
    if p["has_shortcut"]:
        p["sc_w"], _ = _init_conv(keys[6], out_planes, in_planes, 1, bias=False)
        p["sc_bn"] = _init_bn(keys[7], out_planes)
    return p


def init_resnext(key, num_blocks, cardinality, width, num_classes):
    in_planes = 64
    gcw = cardinality * width
    keys = jax.random.split(key, 3 + sum(num_blocks))
    ki = iter(range(len(keys)))
    params = {}
    params["conv1_w"], params["conv1_b"] = _init_conv(
        keys[next(ki)], in_planes, 3, 7, bias=True)
    params["bn1"] = _init_bn(keys[next(ki)], in_planes)
    layers = []
    for nb, stride in zip(num_blocks, [1, 2, 2, 2]):
        strides = [stride] + [1] * (nb - 1)
        blocks = []
        for s in strides:
            blocks.append(_init_block(keys[next(ki)], in_planes, gcw,
                                      cardinality, s))
            in_planes = BLOCK_MUL * gcw
        gcw *= BLOCK_MUL
        layers.append(blocks)
    params["layers"] = layers
    kw, kb = jax.random.split(keys[next(ki)])
    params["linear_w"] = jax.random.normal(kw, (gcw, num_classes), jnp.float32) * 0.05
    params["linear_b"] = jax.random.normal(kb, (num_classes,), jnp.float32) * 0.05
    return params


# ------------------------------ forward pass ------------------------------

def block_forward(x, p):
    out = conv2d_pallas(x, p["conv1_w"], None, stride=1, padding=0)
    out = pallas_batchnorm(out, *p["bn1"], relu=True)
    out = conv2d_pallas(out, p["conv2_w"], None, stride=p["stride"], padding=1,
                        groups=p["cardinality"])
    out = pallas_batchnorm(out, *p["bn2"], relu=True)
    out = conv2d_pallas(out, p["conv3_w"], None, stride=1, padding=0)
    if p["has_shortcut"]:
        sc = conv2d_pallas(x, p["sc_w"], None, stride=p["stride"], padding=0)
        sc = pallas_batchnorm(sc, *p["sc_bn"], relu=False)
    else:
        sc = x
    # bn3 + residual add + ReLU fused in one Pallas pass.
    return pallas_batchnorm(out, *p["bn3"], relu=True, residual=sc)


def resnext_forward(params, x_nchw):
    x = jnp.transpose(x_nchw, (0, 2, 3, 1))  # NCHW -> NHWC
    out = conv2d_pallas(x, params["conv1_w"], params["conv1_b"],
                        stride=2, padding=3)
    out = pallas_batchnorm(out, *params["bn1"], relu=True)
    out = maxpool_pallas(out, K=3, stride=2, padding=1)
    for blocks in params["layers"]:
        for bp in blocks:
            out = block_forward(out, bp)
    return avgpool_linear_pallas(out, params["linear_w"], params["linear_b"])


# ------------------------------ main ------------------------------

if __name__ == "__main__":
    key = jax.random.PRNGKey(0)
    kp, kx = jax.random.split(key)
    # small config: num_blocks=[1,1,1,1], cardinality=2, width=4, 10 classes
    params = init_resnext(kp, num_blocks=[1, 1, 1, 1], cardinality=2, width=4,
                          num_classes=10)
    x = jax.random.normal(kx, (2, 3, 32, 32), jnp.float32)  # NCHW like PyTorch
    out = resnext_forward(params, x)
    jax.block_until_ready(out)
    assert out.shape == (2, 10), out.shape
    assert bool(jnp.all(jnp.isfinite(out)))
    print("KERNEL_OK")
</pallas_src>

<mosaic_0001>
module attributes {stable_mosaic.version = 11 : i64} {
  func.func @matmul_bias_kernel(%arg0: i32, %arg1: i32, %arg2: i32, %arg3: i32, %arg4: memref<1x256x256xbf16, #tpu.memory_space<vmem>>, %arg5: memref<1x256x128xbf16, #tpu.memory_space<vmem>>, %arg6: memref<1x1x128xf32, #tpu.memory_space<vmem>>, %arg7: memref<1x256x128xf32, #tpu.memory_space<vmem>>, %arg8: memref<256x128xf32, #tpu.memory_space<vmem>>) attributes {dimension_semantics = [#tpu.dimension_semantics<parallel>, #tpu.dimension_semantics<parallel>, #tpu.dimension_semantics<parallel>, #tpu.dimension_semantics<arbitrary>], iteration_bounds = array<i64: 1, 2, 1, 1>, scalar_prefetch = 0 : i64, scratch_operands = 1 : i64, tpu.core_type = #tpu.core_type<tc>, window_params = [{transform_indices = @transform_0, window_bounds = array<i64: 1, 256, 256>}, {transform_indices = @transform_1, window_bounds = array<i64: 1, 256, 128>}, {transform_indices = @transform_2, window_bounds = array<i64: 1, 1, 128>}, {transform_indices = @transform_3, window_bounds = array<i64: 1, 256, 128>}]} {
    %c0_i32 = arith.constant 0 : i32
    %0 = arith.cmpi eq, %arg3, %c0_i32 : i32
    %1 = arith.extui %0 : i1 to i32
    %c0_i32_0 = arith.constant 0 : i32
    %2 = arith.cmpi ne, %1, %c0_i32_0 : i32
    scf.if %2 {
      %cst_12 = arith.constant 0.000000e+00 : f32
      %14 = vector.broadcast %cst_12 : f32 to vector<256x128xf32>
      %c0_13 = arith.constant 0 : index
      %c0_14 = arith.constant 0 : index
      %15 = vector.load %arg8[%c0_13, %c0_14] : memref<256x128xf32, #tpu.memory_space<vmem>>, vector<256x128xf32>
      tpu.vector_store %arg8[%c0_13, %c0_14], %14 {strides = array<i32>} : memref<256x128xf32, #tpu.memory_space<vmem>>, vector<256x128xf32>,
    } else {
    }
    %c0 = arith.constant 0 : index
    %c0_1 = arith.constant 0 : index
    %3 = vector.load %arg8[%c0, %c0_1] : memref<256x128xf32, #tpu.memory_space<vmem>>, vector<256x128xf32>
    %c0_2 = arith.constant 0 : index
    %c0_3 = arith.constant 0 : index
    %c0_4 = arith.constant 0 : index
    %4 = vector.load %arg4[%c0_2, %c0_3, %c0_4] : memref<1x256x256xbf16, #tpu.memory_space<vmem>>, vector<1x256x256xbf16>
    %5 = vector.shape_cast %4 : vector<1x256x256xbf16> to vector<256x256xbf16>
    %c0_5 = arith.constant 0 : index
    %c0_6 = arith.constant 0 : index
    %c0_7 = arith.constant 0 : index
    %6 = vector.load %arg5[%c0_5, %c0_6, %c0_7] : memref<1x256x128xbf16, #tpu.memory_space<vmem>>, vector<1x256x128xbf16>
    %7 = vector.shape_cast %6 : vector<1x256x128xbf16> to vector<256x128xbf16>
    %cst = arith.constant dense<0.000000e+00> : vector<256x128xf32>
    %8 = tpu.matmul %5, %7, %cst {dimension_numbers = #tpu.dot_dimension_numbers<[1], [0], [0], [1], [0, 0, 1, 1], [], []>} : vector<256x256xbf16>, vector<256x128xbf16>, vector<256x128xf32> -> vector<256x128xf32>
    %9 = arith.addf %3, %8 : vector<256x128xf32>
    %c0_8 = arith.constant 0 : index
    %c0_9 = arith.constant 0 : index
    %10 = vector.load %arg8[%c0_8, %c0_9] : memref<256x128xf32, #tpu.memory_space<vmem>>, vector<256x128xf32>
    tpu.vector_store %arg8[%c0_8, %c0_9], %9 {strides = array<i32>} : memref<256x128xf32, #tpu.memory_space<vmem>>, vector<256x128xf32>,
    %c0_i32_10 = arith.constant 0 : i32
    %11 = arith.cmpi eq, %arg3, %c0_i32_10 : i32
    %12 = arith.extui %11 : i1 to i32
    %c0_i32_11 = arith.constant 0 : i32
    %13 = arith.cmpi ne, %12, %c0_i32_11 : i32
    scf.if %13 {
      %c0_12 = arith.constant 0 : index
      %c0_13 = arith.constant 0 : index
      %14 = vector.load %arg8[%c0_12, %c0_13] : memref<256x128xf32, #tpu.memory_space<vmem>>, vector<256x128xf32>
      %c0_14 = arith.constant 0 : index
      %c0_15 = arith.constant 0 : index
      %c0_16 = arith.constant 0 : index
      %15 = vector.load %arg6[%c0_14, %c0_15, %c0_16] : memref<1x1x128xf32, #tpu.memory_space<vmem>>, vector<1x1x128xf32>
      %16 = vector.shape_cast %15 : vector<1x1x128xf32> to vector<1x128xf32>
      %17 = vector.broadcast %16 : vector<1x128xf32> to vector<256x128xf32>
      %18 = arith.addf %14, %17 : vector<256x128xf32>
      %c0_17 = arith.constant 0 : index
      %c0_18 = arith.constant 0 : index
      %c0_19 = arith.constant 0 : index
      %19 = vector.load %arg7[%c0_17, %c0_18, %c0_19] : memref<1x256x128xf32, #tpu.memory_space<vmem>>, vector<1x256x128xf32>
      %20 = vector.shape_cast %19 : vector<1x256x128xf32> to vector<256x128xf32>
      %21 = vector.shape_cast %18 : vector<256x128xf32> to vector<1x256x128xf32>
      tpu.vector_store %arg7[%c0_17, %c0_18, %c0_19], %21 {strides = array<i32>} : memref<1x256x128xf32, #tpu.memory_space<vmem>>, vector<1x256x128xf32>,
    } else {
    }
    return
  }
  func.func @transform_0(%arg0: i32, %arg1: i32, %arg2: i32, %arg3: i32) -> (i32, i32, i32) {
    %c0_i32 = arith.constant 0 : i32
    return %arg0, %arg1, %arg3 : i32, i32, i32
  }
  func.func @transform_1(%arg0: i32, %arg1: i32, %arg2: i32, %arg3: i32) -> (i32, i32, i32) {
    %c0_i32 = arith.constant 0 : i32
    return %arg0, %arg3, %arg2 : i32, i32, i32
  }
  func.func @transform_2(%arg0: i32, %arg1: i32, %arg2: i32, %arg3: i32) -> (i32, i32, i32) {
    %c0_i32 = arith.constant 0 : i32
    %c0_i32_0 = arith.constant 0 : i32
    return %arg0, %c0_i32, %arg2 : i32, i32, i32
  }
  func.func @transform_3(%arg0: i32, %arg1: i32, %arg2: i32, %arg3: i32) -> (i32, i32, i32) {
    %c0_i32 = arith.constant 0 : i32
    return %arg0, %arg1, %arg2 : i32, i32, i32
  }
}

</mosaic_0001>

<bundles_post_ra>
// kernel: tpu_custom_call.1
= control target key start
LH: loop header
LB: loop body
LE: loop exit
PB: predicated region body
PF: predicated region fallthrough
CT: control target
= control target key end

     0   :  { %8 = vsyncpa [#allocation4], 0  ;;  %s1953_s0 = inlined_call_operand.hbm [shape: bf16[1,512,256], index: 0, kind: input, shape index: {}]   ;;  %s1954_s1 = inlined_call_operand.hbm [shape: bf16[1,256,128], index: 1, kind: input, shape index: {}]   ;;  %s1955_s2 = inlined_call_operand.vmem [shape: f32[1,1,128], index: 2, kind: input, shape index: {}]   ;;  %s1956_s3 = inlined_call_operand.hbm [shape: f32[1,512,128], index: 3, kind: output, shape index: {}]  }
   0x1   :  { %10 = vsyncpa [#allocation4 + $0x1], 0 }
   0x2   :  { %11 = vsyncpa [#allocation7], 0 }
   0x3   :  { %12 = vsyncpa [#allocation5], 0 }
   0x4   :  { %14 = vsyncpa [#allocation5 + $0x1], 0  ;;  %s1662_s12 = smov 0   ;;  %s1664_s13 = smov 0  }
   0x5   :  { %s1666_s14 = smov 0   ;;  %s1668_s15 = smov 0  }
   0x6   :  { %s1670_s16 = smov 0   ;;  %s1672_s17 = smov 0  }
   0x7 LB: > { %s1151_s18 = sadd.s32 4294967295, %s1631_s17   ;;  %s1152_s19 = sadd.s32 4294967294, %s1631_s17   ;;  %s1631_s17 = sphi %s1672_s17, %s20_s17   ;;  %s1627_s16 = sphi %s1670_s16, %s1974_s16   ;;  %s1623_s15 = sphi %s1668_s15, %s1973_s15   ;;  %s1619_s14 = sphi %s1666_s14, %s1972_s14   ;;  %s1615_s13 = sphi %s1664_s13, %s1971_s13   ;;  %s1611_s12 = sphi %s1662_s12, %s1970_s12  }
   0x8   : > { %p70_p0 = scmp.ne.s32.totalorder %s1615_s13, %s1611_s12  ;;  %p1696_p1 = scmp.eq.s32.totalorder %s1151_s18, 0 }
   0x9   : > { %p1700_p2 = scmp.eq.s32.totalorder %s1151_s18, 1  ;;  %p162_p3 = scmp.eq.s32.totalorder %s1152_s19, 1 }
   0xa   : > { %p1706_p4 = por %p1696_p1, %p70_p0  ;;  %p1153_p5 = scmp.ge.s32.totalorder %s1631_s17, 1 }
   0xb   : > { %p1711_p6 = por %p162_p3, %p70_p0  ;;  %p169_p7 = scmp.lt.s32.totalorder %s1631_s17, 3 }
   0xc   : > { %s1960_s22 = scalar_select %p1706_p4, 1, 0 }
   0xd   : > { %s1961_s23 = scalar_select %p1711_p6, 1, 0 }
   0xe   : > { %p1716_p8 = pnand %p1153_p5, %p169_p7  ;;  %s1633_s25 = smov [#allocation6]  }
   0xf   : > { %s187_s26 = sshll.u32 %s1633_s25, 4  ;;  %s42_s28 = sadd.s32 1, %s1627_s16  ;;  %s188_s26 = int_to_ptr.vmem [resolvable:$true] %s187_s26 }
  0x10   : > { %p1358_p9 = pneg %p1716_p8  ;;  %s1504_s29 = scalar_lea.vmem %s188_s26, 2048 }
  0x11   : > { %p1505_p13 = scmp.ne.s32.totalorder %s188_s26, %s1504_s29  ;;  %p1512_p5 = scmp.lt.s32.totalorder %s188_s26, %s188_s26 }
  0x12   : > { %p1725_p11 = pnand %p1358_p9, %p1696_p1  ;;  %p1513_p7 = scmp.lt.s32.totalorder %s1504_s29, %s1504_s29 }
  0x14   : > { %p1495_p12 = pneg %p1725_p11  ;;  %p1514_p6 = por %p1513_p7, %p1512_p5 }
  0x16   : > { %p1507_p0 = pnand %p1505_p13, %p1495_p12 }
  0x18   : > { %p1508_p3 = pneg %p1507_p0 }
  0x1a   : > { %p1515_p4 = pnand %p1514_p6, %p1508_p3 }
  0x1c   : > { %1518 = shalt.err (!%p1515_p4)
}
  0x1d   : > { %s1634_s30 = smov 64   ;;  %s1635_s4 = smov 4  }
  0x1e   : > { %1361 = dma.hbm_to_vmem [thread:$0]  (!%p1725_p11), %s1954_s1, 2048, %s188_s26, [#allocation7], %s1634_s30, %s1634_s30, %s1635_s4  }
  0x1f   : > { %p44_p6 = scmp.ge.s32.totalorder %s42_s28, 2  ;;  %s57_s7 = sadd.s32 1, %s1619_s14 }
  0x20   : > { %p64_p4 = scmp.ne.s32.totalorder %s1619_s14, %s1615_s13  ;;  %p65_p9 = scmp.eq.s32.totalorder %s1631_s17, 0 }
  0x21   : > { %s1976_s28 = smov (%p44_p6, %s42_s28), 0  ;;  %p1371_p0 = scmp.lt.s32.totalorder %s1631_s17, 2 }
  0x22   : > { %p1743_p12 = por %p65_p9, %p64_p4  ;;  %p1749_p13 = por %p1700_p2, %p64_p4 }
  0x23   : > { %s51_s10 = ssub.s32 %s1627_s16, %s1976_s28  ;;  %s210_s11 = sand.u32 1, %s1619_s14  }
  0x24   : > { %p55_p11 = scmp.eq.s32.totalorder %s51_s10, 0  ;;  %s1157_s18 = sshll.u32 %s210_s11, 8 }
  0x25   : > { %s1220_s25 = sshll.u32 %s1627_s16, 12  ;;  %s214_s30 = scalar_lea.vmem [#allocation3], %s1157_s18 }
  0x26   : > { %s1758_s19 = scalar_select %p55_p11, %s1619_s14, %s57_s7  }
  0x27   : > { %s225_s29 = scalar_lea.hbm %s1953_s0, %s1220_s25  ;;  %s226_s4 = sshll.u32 %s214_s30, 4  ;;  %s227_s4 = int_to_ptr.vmem [resolvable:$true] %s226_s4 }
  0x28   : > { %p1766_p2 = pnand %p1371_p0, %p1743_p12  ;;  %s211_s5 = scalar_lea.sflag [#allocation4], %s210_s11 }
  0x29   : > { %s1532_s6 = scalar_lea.vmem %s227_s4, 4096  ;;  %s1636_s7 = smov [#allocation3]  }
  0x2a   : > { %p1521_p3 = pneg %p1766_p2  ;;  %p1533_p5 = scmp.ne.s32.totalorder %s227_s4, %s1532_s6 }
  0x2b   : > { %s1537_s10 = sshll.u32 %s1636_s7, 4  ;;  %s1538_s10 = int_to_ptr.vmem [resolvable:$false] %s1537_s10 }
  0x2c   : > { %p1535_p7 = pnand %p1533_p5, %p1521_p3  ;;  %s1539_s25 = scalar_lea.vmem %s1538_s10, 8192 }
  0x2d   : > { %p1540_p4 = scmp.lt.s32.totalorder %s227_s4, %s1538_s10  ;;  %p1541_p9 = scmp.lt.s32.totalorder %s1539_s25, %s1532_s6 }
  0x2e   : > { %p1536_p6 = pneg %p1535_p7 }
  0x2f   : > { %p1542_p11 = por %p1541_p9, %p1540_p4 }
  0x31   : > { %p1543_p10 = pnand %p1542_p11, %p1536_p6 }
  0x33   : > { %1546 = shalt.err (!%p1543_p10)
}
  0x34   : > { %s1637_s8 = smov 128   ;;  %s1638_s18 = smov 8  }
  0x35   : > { %1365 = dma.hbm_to_vmem [thread:$0]  (!%p1766_p2), %s225_s29, 4096, %s227_s4, %s211_s5, %s1637_s8, %s1637_s8, %s1638_s18  }
  0x36   : > { %238 = sbr.rel (%p1716_p8) target bundleno = 368 (0x170), region = 32  ;;  %s1777_s11 = sand.u32 (!%p1716_p8), 1, %s1615_s13  }
  0x37   : > { %s1162_s26 = sshll.u32 (!%p1716_p8), %s1777_s11, 8  ;;  %s241_s27 = scalar_lea.sflag (!%p1716_p8), [#allocation4], %s1777_s11 }
  0x38   : > { %s1783_s30 = scalar_lea.vmem (!%p1716_p8), [#allocation3], %s1162_s26  ;;  %p1967_p10 = scmp.ne.s32.totalorder (!%p1716_p8), %s1960_s22, 0 }
  0x3b   : > { %1598 = dma.done.wait (%p1967_p10), %s241_s27, 4096  }
  0x3c   : > { %1600 = vsyncadd (%p1967_p10), %s241_s27, 4294963200 }
  0x3d   : > { %1602 = dma.done.wait (%p1696_p1), [#allocation7], 2048  }
  0x3e   : > { %1604 = vsyncadd (%p1696_p1), [#allocation7], 4294965248  ;;  %v1429_v0 = vld [vmem:[#allocation6 + $0x78] sm:$0xff]   ;;  %v1431_v2 = vld [vmem:[#allocation6 + $0x70] sm:$0xff]   ;;  %s1834_s24 = scalar_lea.vmem [#allocation8], %s1162_s26  ;;  %s1221_s29 = sshll.u32 %s1623_s15, 12 }
  0x3f   : > { %v1430_v1 = vld [vmem:[#allocation6 + $0x38] sm:$0xff]   ;;  %1222 = vmatprep.subr.bf16.mxu0 %v1429_v0  ;;  %1334 = vmatprep.subr.bf16.mxu1 %v1429_v0  ;;  %v1432_v3 = vld [vmem:[#allocation6 + $0x30] sm:$0xff]   ;;  %v1433_v4 = vld [vmem:[#allocation6 + $0x68] sm:$0xff]   ;;  %s1024_s4 = sshll.u32 %s1834_s24, 4  ;;  %s1899_s6 = scalar_lea.hbm %s1956_s3, %s1221_s29  ;;  %s1901_s4 = int_to_ptr.vmem [resolvable:$true] %s1024_s4 }
  0x40   : > { %1223 = vmatpush3.bf16.msra.mxu0 %v1430_v1  ;;  %1342 = vmatpush3.bf16.msra.mxu1 %v1430_v1  ;;  %v1434_v5 = vld [vmem:[#allocation6 + $0x28] sm:$0xff]   ;;  %v1435_v6 = vld [vmem:[#allocation6 + $0x60] sm:$0xff]   ;;  %v1437_v8 = vld [vmem:[#allocation6 + $0x58] sm:$0xff]   ;;  %s1008_s15 = scalar_lea.sflag [#allocation5], %s1777_s11  ;;  %s1547_s7 = scalar_lea.vmem %s1901_s4, 4096 }
  0x41   : > { %1224 = vmatprep.subr.bf16.mxu0 %v1431_v2  ;;  %1335 = vmatprep.subr.bf16.mxu1 %v1431_v2  ;;  %v1436_v7 = vld [vmem:[#allocation6 + $0x20] sm:$0xff]   ;;  %v1438_v9 = vld [vmem:[#allocation6 + $0x18] sm:$0xff]   ;;  %v1439_v10 = vld [vmem:[#allocation6 + $0x50] sm:$0xff]   ;;  %p1548_p1 = scmp.ne.s32.totalorder %s1901_s4, %s1547_s7  ;;  %s1639_s10 = smov [#allocation8]  }
  0x42   : > { %v1447_v11 = vld [vmem:[%s1783_s30 + $0x4] ss:$8 sps:$4 sm:$0xff]   ;;  %v1440_v13 = vld [vmem:[#allocation6 + $0x10] sm:$0xff]   ;;  %v1445_v18 = vld [vmem:[%s1783_s30] ss:$8 sps:$4 sm:$0xff]   ;;  %s1551_s25 = sshll.u32 %s1639_s10, 4  ;;  %s1552_s25 = int_to_ptr.vmem [resolvable:$false] %s1551_s25 }
  0x43   : > { %v1450_v12 = vld [vmem:[%s1783_s30 + $0x84] ss:$8 sps:$4 sm:$0xff]   ;;  %708 = vmatprep.mubr.bf16.mxu0 %v1447_v11  ;;  %v1448_v19 = vld [vmem:[%s1783_s30 + $0x80] ss:$8 sps:$4 sm:$0xff]   ;;  %v1451_v20 = vld [vmem:[%s1783_s30 + $0x14] ss:$8 sps:$4 sm:$0xff]   ;;  %p1549_p8 = pnand %p1548_p1, %p1749_p13  ;;  %p1554_p0 = scmp.lt.s32.totalorder %s1901_s4, %s1552_s25 }
  0x44   : > { %1225 = vmatpush3.bf16.msra.mxu0 %v1432_v3  ;;  %1343 = vmatpush3.bf16.msra.mxu1 %v1432_v3  ;;  %v1441_v14 = vld [vmem:[#allocation6 + $0x48] sm:$0xff]   ;;  %v1443_v16 = vld [vmem:[#allocation6 + $0x40] sm:$0xff]   ;;  %v1453_v21 = vld [vmem:[%s1783_s30 + $0x94] ss:$8 sps:$4 sm:$0xff]   ;;  %s1553_s8 = scalar_lea.vmem %s1552_s25, 8192 }
  0x45   : > { %1226 = vmatprep.subr.bf16.mxu0 %v1433_v4  ;;  %1336 = vmatprep.subr.bf16.mxu1 %v1433_v4  ;;  %v1442_v15 = vld [vmem:[#allocation6 + $0x8] sm:$0xff]   ;;  %v1444_v17 = vld [vmem:[#allocation6] sm:$0xff]   ;;  %v1455_v22 = vld [vmem:[%s1783_s30 + $0x10] ss:$8 sps:$4 sm:$0xff]   ;;  %p1550_p12 = pneg %p1549_p8  ;;  %p1555_p2 = scmp.lt.s32.totalorder %s1553_s8, %s1547_s7 }
  0x46   : > { %772 = vmatprep.mubr.bf16.mxu1 %v1450_v12  ;;  %v1456_v23 = vld [vmem:[%s1783_s30 + $0x90] ss:$8 sps:$4 sm:$0xff]   ;;  %v1457_v24 = vld [vmem:[%s1783_s30 + $0x24] ss:$8 sps:$4 sm:$0xff]   ;;  %v1461_v26 = vld [vmem:[%s1783_s30 + $0x20] ss:$8 sps:$4 sm:$0xff]  }
  0x47   : > { %v1459_v25 = vld [vmem:[%s1783_s30 + $0xa4] ss:$8 sps:$4 sm:$0xff]   ;;  %v1462_v27 = vld [vmem:[%s1783_s30 + $0xa0] ss:$8 sps:$4 sm:$0xff]   ;;  %v1463_v28 = vld [vmem:[%s1783_s30 + $0x34] ss:$8 sps:$4 sm:$0xff]   ;;  %p1556_p3 = por %p1555_p2, %p1554_p0 }
  0x48   : > { %1227 = vmatpush3.bf16.msra.mxu0 %v1434_v5  ;;  %1344 = vmatpush3.bf16.msra.mxu1 %v1434_v5  ;;  %v1465_v29 = vld [vmem:[%s1783_s30 + $0xb4] ss:$8 sps:$4 sm:$0xff]   ;;  %v1467_v30 = vld [vmem:[%s1783_s30 + $0x30] ss:$8 sps:$4 sm:$0xff]   ;;  %v1469_v32 = vld [vmem:[%s1783_s30 + $0x44] ss:$8 sps:$4 sm:$0xff]  }
  0x49   : > { %1228 = vmatprep.subr.bf16.mxu0 %v1435_v6  ;;  %1337 = vmatprep.subr.bf16.mxu1 %v1435_v6  ;;  %v1468_v31 = vld [vmem:[%s1783_s30 + $0xb0] ss:$8 sps:$4 sm:$0xff]   ;;  %v1471_v33 = vld [vmem:[%s1783_s30 + $0xc4] ss:$8 sps:$4 sm:$0xff]   ;;  %v1473_v34 = vld [vmem:[%s1783_s30 + $0x40] ss:$8 sps:$4 sm:$0xff]   ;;  %p1557_p5 = pnand %p1556_p3, %p1550_p12 }
  0x4a   : > { %v1474_v35 = vld [vmem:[%s1783_s30 + $0xc0] ss:$8 sps:$4 sm:$0xff]   ;;  %v1475_v36 = vld [vmem:[%s1783_s30 + $0x54] ss:$8 sps:$4 sm:$0xff]   ;;  %v1479_v38 = vld [vmem:[%s1783_s30 + $0x50] ss:$8 sps:$4 sm:$0xff]  }
  0x4b   : > { %v1477_v37 = vld [vmem:[%s1783_s30 + $0xd4] ss:$8 sps:$4 sm:$0xff]   ;;  %v1480_v39 = vld [vmem:[%s1783_s30 + $0xd0] ss:$8 sps:$4 sm:$0xff]   ;;  %v1481_v40 = vld [vmem:[%s1783_s30 + $0x64] ss:$8 sps:$4 sm:$0xff]  }
  0x4c   : > { %1229 = vmatpush3.bf16.msra.mxu0 %v1436_v7  ;;  %1345 = vmatpush3.bf16.msra.mxu1 %v1436_v7  ;;  %v1483_v41 = vld [vmem:[%s1783_s30 + $0xe4] ss:$8 sps:$4 sm:$0xff]   ;;  %v1485_v42 = vld [vmem:[%s1783_s30 + $0x60] ss:$8 sps:$4 sm:$0xff]   ;;  %v1487_v44 = vld [vmem:[%s1783_s30 + $0x74] ss:$8 sps:$4 sm:$0xff]  }
  0x4d   : > { %1230 = vmatprep.subr.bf16.mxu0 %v1437_v8  ;;  %1338 = vmatprep.subr.bf16.mxu1 %v1437_v8  ;;  %v1486_v43 = vld [vmem:[%s1783_s30 + $0xe0] ss:$8 sps:$4 sm:$0xff]   ;;  %v1489_v45 = vld [vmem:[%s1783_s30 + $0xf4] ss:$8 sps:$4 sm:$0xff]   ;;  %v1491_v46 = vld [vmem:[%s1783_s30 + $0x70] ss:$8 sps:$4 sm:$0xff]  }
  0x4e   : > { %v1492_v47 = vld [vmem:[%s1783_s30 + $0xf0] ss:$8 sps:$4 sm:$0xff]   ;;  %v1828_v51 = vld [vmem:[%s1955_s2] ss:$0 sm:$0xff] }
  0x50   : > { %1231 = vmatpush3.bf16.msra.mxu0 %v1438_v9  ;;  %1346 = vmatpush3.bf16.msra.mxu1 %v1438_v9 }
  0x51   : > { %1232 = vmatprep.subr.bf16.mxu0 %v1439_v10  ;;  %1339 = vmatprep.subr.bf16.mxu1 %v1439_v10 }
  0x54   : > { %1233 = vmatpush3.bf16.msra.mxu0 %v1440_v13  ;;  %1347 = vmatpush3.bf16.msra.mxu1 %v1440_v13 }
  0x55   : > { %1234 = vmatprep.subr.bf16.mxu0 %v1441_v14  ;;  %1340 = vmatprep.subr.bf16.mxu1 %v1441_v14 }
  0x58   : > { %1235 = vmatpush3.bf16.msra.mxu0 %v1442_v15  ;;  %1348 = vmatpush3.bf16.msra.mxu1 %v1442_v15 }
  0x59   : > { %1236 = vmatprep.subr.bf16.mxu0 %v1443_v16  ;;  %1341 = vmatprep.subr.bf16.mxu1 %v1443_v16 }
  0x5c   : > { %1237 = vmatpush3.bf16.msra.mxu0 %v1444_v17  ;;  %1349 = vmatpush3.bf16.msra.mxu1 %v1444_v17 }
  0x5f   : > { %709 = vmatmul.mubr.bf16.vlgmr.msra.gmra.mxu0 %v1445_v18  ;;  %773 = vmatmul.mubr.bf16.vlgmr.msra.gmra.mxu1 %v1448_v19 }
  0x60   : > { %716 = vmatprep.mubr.bf16.mxu0 %v1451_v20  ;;  %780 = vmatprep.mubr.bf16.mxu1 %v1453_v21 }
  0x67   : > { %717 = vmatmul.mubr.bf16.gmra.mxu0 %v1455_v22  ;;  %781 = vmatmul.mubr.bf16.gmra.mxu1 %v1456_v23 }
  0x68   : > { %724 = vmatprep.mubr.bf16.mxu0 %v1457_v24  ;;  %788 = vmatprep.mubr.bf16.mxu1 %v1459_v25 }
  0x6f   : > { %725 = vmatmul.mubr.bf16.gmra.mxu0 %v1461_v26  ;;  %789 = vmatmul.mubr.bf16.gmra.mxu1 %v1462_v27 }
  0x70   : > { %732 = vmatprep.mubr.bf16.mxu0 %v1463_v28  ;;  %796 = vmatprep.mubr.bf16.mxu1 %v1465_v29 }
  0x77   : > { %733 = vmatmul.mubr.bf16.gmra.mxu0 %v1467_v30  ;;  %797 = vmatmul.mubr.bf16.gmra.mxu1 %v1468_v31 }
  0x78   : > { %740 = vmatprep.mubr.bf16.mxu0 %v1469_v32  ;;  %804 = vmatprep.mubr.bf16.mxu1 %v1471_v33 }
  0x7f   : > { %741 = vmatmul.mubr.bf16.gmra.mxu0 %v1473_v34  ;;  %805 = vmatmul.mubr.bf16.gmra.mxu1 %v1474_v35 }
  0x80   : > { %748 = vmatprep.mubr.bf16.mxu0 %v1475_v36  ;;  %812 = vmatprep.mubr.bf16.mxu1 %v1477_v37 }
  0x87   : > { %749 = vmatmul.mubr.bf16.gmra.mxu0 %v1479_v38  ;;  %813 = vmatmul.mubr.bf16.gmra.mxu1 %v1480_v39 }
  0x88   : > { %756 = vmatprep.mubr.bf16.mxu0 %v1481_v40  ;;  %820 = vmatprep.mubr.bf16.mxu1 %v1483_v41 }
  0x8f   : > { %757 = vmatmul.mubr.bf16.gmra.mxu0 %v1485_v42  ;;  %821 = vmatmul.mubr.bf16.gmra.mxu1 %v1486_v43 }
  0x90   : > { %764 = vmatprep.mubr.bf16.mxu0 %v1487_v44  ;;  %828 = vmatprep.mubr.bf16.mxu1 %v1489_v45 }
  0x97   : > { %765 = vmatmul.mubr.bf16.gmra.mxu0 %v1491_v46  ;;  %829 = vmatmul.mubr.bf16.gmra.mxu1 %v1492_v47 }
 0x11f   : > { %v1238_v48 = vpop.f32.mrf.mxu0  ;;  %v1286_v49 = vpop.f32.mrf.mxu1 }
 0x121   : > { %v1239_v50 = vpop.f32.mrf.mxu0  ;;  %v1287_v52 = vpop.f32.mrf.mxu1 }
 0x122   : > { %v1240_v53 = vadd.f32 %v1239_v50, %v1238_v48  ;;  %v1288_v54 = vadd.f32 %v1287_v52, %v1286_v49 }
 0x123   : > { %v1241_v55 = vpop.f32.mrf.mxu0  ;;  %v1289_v56 = vpop.f32.mrf.mxu1 }
 0x124   : > { %v943_v57 = vadd.f32 %v1240_v53, %v1828_v51  ;;  %v959_v58 = vadd.f32 %v1288_v54, %v1828_v51 }
 0x125   : > { %v1242_v59 = vpop.f32.mrf.mxu0  ;;  %v1290_v60 = vpop.f32.mrf.mxu1 }
 0x126   : > { %975 = vst [vmem:[%s1834_s24] sm:$0xff] %v943_v57  ;;  %991 = vst [vmem:[%s1834_s24 + $0x80] sm:$0xff] %v959_v58  ;;  %v1243_v61 = vadd.f32 %v1242_v59, %v1241_v55  ;;  %v1291_v62 = vadd.f32 %v1290_v60, %v1289_v56 }
 0x127   : > { %v1244_v63 = vpop.f32.mrf.mxu0  ;;  %v1292_v0 = vpop.f32.mrf.mxu1 }
 0x128   : > { %v944_v1 = vadd.f32 %v1243_v61, %v1828_v51  ;;  %v960_v2 = vadd.f32 %v1291_v62, %v1828_v51 }
 0x129   : > { %v1245_v3 = vpop.f32.mrf.mxu0  ;;  %v1293_v4 = vpop.f32.mrf.mxu1 }
 0x12a   : > { %976 = vst [vmem:[%s1834_s24 + $0x8] sm:$0xff] %v944_v1  ;;  %992 = vst [vmem:[%s1834_s24 + $0x88] sm:$0xff] %v960_v2  ;;  %v1246_v5 = vadd.f32 %v1245_v3, %v1244_v63  ;;  %v1294_v6 = vadd.f32 %v1293_v4, %v1292_v0 }
 0x12b   : > { %v1247_v7 = vpop.f32.mrf.mxu0  ;;  %v1295_v8 = vpop.f32.mrf.mxu1 }
 0x12c   : > { %v945_v9 = vadd.f32 %v1246_v5, %v1828_v51  ;;  %v961_v10 = vadd.f32 %v1294_v6, %v1828_v51 }
 0x12d   : > { %v1248_v11 = vpop.f32.mrf.mxu0  ;;  %v1296_v12 = vpop.f32.mrf.mxu1 }
 0x12e   : > { %977 = vst [vmem:[%s1834_s24 + $0x10] sm:$0xff] %v945_v9  ;;  %993 = vst [vmem:[%s1834_s24 + $0x90] sm:$0xff] %v961_v10  ;;  %v1249_v13 = vadd.f32 %v1248_v11, %v1247_v7  ;;  %v1297_v14 = vadd.f32 %v1296_v12, %v1295_v8 }
 0x12f   : > { %v1250_v15 = vpop.f32.mrf.mxu0  ;;  %v1298_v16 = vpop.f32.mrf.mxu1 }
 0x130   : > { %v946_v17 = vadd.f32 %v1249_v13, %v1828_v51  ;;  %v962_v18 = vadd.f32 %v1297_v14, %v1828_v51 }
 0x131   : > { %v1251_v19 = vpop.f32.mrf.mxu0  ;;  %v1299_v20 = vpop.f32.mrf.mxu1 }
 0x132   : > { %978 = vst [vmem:[%s1834_s24 + $0x18] sm:$0xff] %v946_v17  ;;  %994 = vst [vmem:[%s1834_s24 + $0x98] sm:$0xff] %v962_v18  ;;  %v1252_v21 = vadd.f32 %v1251_v19, %v1250_v15  ;;  %v1300_v22 = vadd.f32 %v1299_v20, %v1298_v16 }
 0x133   : > { %v1253_v23 = vpop.f32.mrf.mxu0  ;;  %v1301_v24 = vpop.f32.mrf.mxu1 }
 0x134   : > { %v947_v25 = vadd.f32 %v1252_v21, %v1828_v51  ;;  %v963_v26 = vadd.f32 %v1300_v22, %v1828_v51 }
 0x135   : > { %v1254_v27 = vpop.f32.mrf.mxu0  ;;  %v1302_v28 = vpop.f32.mrf.mxu1 }
 0x136   : > { %979 = vst [vmem:[%s1834_s24 + $0x20] sm:$0xff] %v947_v25  ;;  %995 = vst [vmem:[%s1834_s24 + $0xa0] sm:$0xff] %v963_v26  ;;  %v1255_v29 = vadd.f32 %v1254_v27, %v1253_v23  ;;  %v1303_v30 = vadd.f32 %v1302_v28, %v1301_v24 }
 0x137   : > { %v1256_v31 = vpop.f32.mrf.mxu0  ;;  %v1304_v32 = vpop.f32.mrf.mxu1 }
 0x138   : > { %v948_v33 = vadd.f32 %v1255_v29, %v1828_v51  ;;  %v964_v34 = vadd.f32 %v1303_v30, %v1828_v51 }
 0x139   : > { %v1257_v35 = vpop.f32.mrf.mxu0  ;;  %v1305_v36 = vpop.f32.mrf.mxu1 }
 0x13a   : > { %980 = vst [vmem:[%s1834_s24 + $0x28] sm:$0xff] %v948_v33  ;;  %996 = vst [vmem:[%s1834_s24 + $0xa8] sm:$0xff] %v964_v34  ;;  %v1258_v37 = vadd.f32 %v1257_v35, %v1256_v31  ;;  %v1306_v38 = vadd.f32 %v1305_v36, %v1304_v32 }
 0x13b   : > { %v1259_v39 = vpop.f32.mrf.mxu0  ;;  %v1307_v40 = vpop.f32.mrf.mxu1 }
 0x13c   : > { %v949_v41 = vadd.f32 %v1258_v37, %v1828_v51  ;;  %v965_v42 = vadd.f32 %v1306_v38, %v1828_v51 }
 0x13d   : > { %v1260_v43 = vpop.f32.mrf.mxu0  ;;  %v1308_v44 = vpop.f32.mrf.mxu1 }
 0x13e   : > { %981 = vst [vmem:[%s1834_s24 + $0x30] sm:$0xff] %v949_v41  ;;  %997 = vst [vmem:[%s1834_s24 + $0xb0] sm:$0xff] %v965_v42  ;;  %v1261_v45 = vadd.f32 %v1260_v43, %v1259_v39  ;;  %v1309_v46 = vadd.f32 %v1308_v44, %v1307_v40 }
 0x13f   : > { %v1262_v47 = vpop.f32.mrf.mxu0  ;;  %v1310_v48 = vpop.f32.mrf.mxu1 }
 0x140   : > { %v950_v49 = vadd.f32 %v1261_v45, %v1828_v51  ;;  %v966_v50 = vadd.f32 %v1309_v46, %v1828_v51 }
 0x141   : > { %v1263_v52 = vpop.f32.mrf.mxu0  ;;  %v1311_v53 = vpop.f32.mrf.mxu1 }
 0x142   : > { %982 = vst [vmem:[%s1834_s24 + $0x38] sm:$0xff] %v950_v49  ;;  %998 = vst [vmem:[%s1834_s24 + $0xb8] sm:$0xff] %v966_v50  ;;  %v1264_v54 = vadd.f32 %v1263_v52, %v1262_v47  ;;  %v1312_v55 = vadd.f32 %v1311_v53, %v1310_v48 }
 0x143   : > { %v1265_v56 = vpop.f32.mrf.mxu0  ;;  %v1313_v57 = vpop.f32.mrf.mxu1 }
 0x144   : > { %v951_v58 = vadd.f32 %v1264_v54, %v1828_v51  ;;  %v967_v59 = vadd.f32 %v1312_v55, %v1828_v51 }
 0x145   : > { %v1266_v60 = vpop.f32.mrf.mxu0  ;;  %v1314_v61 = vpop.f32.mrf.mxu1 }
 0x146   : > { %983 = vst [vmem:[%s1834_s24 + $0x40] sm:$0xff] %v951_v58  ;;  %999 = vst [vmem:[%s1834_s24 + $0xc0] sm:$0xff] %v967_v59  ;;  %v1267_v62 = vadd.f32 %v1266_v60, %v1265_v56  ;;  %v1315_v63 = vadd.f32 %v1314_v61, %v1313_v57 }
 0x147   : > { %v1268_v0 = vpop.f32.mrf.mxu0  ;;  %v1316_v1 = vpop.f32.mrf.mxu1 }
 0x148   : > { %v952_v2 = vadd.f32 %v1267_v62, %v1828_v51  ;;  %v968_v3 = vadd.f32 %v1315_v63, %v1828_v51 }
 0x149   : > { %v1269_v4 = vpop.f32.mrf.mxu0  ;;  %v1317_v5 = vpop.f32.mrf.mxu1 }
 0x14a   : > { %984 = vst [vmem:[%s1834_s24 + $0x48] sm:$0xff] %v952_v2  ;;  %1000 = vst [vmem:[%s1834_s24 + $0xc8] sm:$0xff] %v968_v3  ;;  %v1270_v6 = vadd.f32 %v1269_v4, %v1268_v0  ;;  %v1318_v7 = vadd.f32 %v1317_v5, %v1316_v1 }
 0x14b   : > { %v1271_v8 = vpop.f32.mrf.mxu0  ;;  %v1319_v9 = vpop.f32.mrf.mxu1 }
 0x14c   : > { %v953_v10 = vadd.f32 %v1270_v6, %v1828_v51  ;;  %v969_v11 = vadd.f32 %v1318_v7, %v1828_v51 }
 0x14d   : > { %v1272_v12 = vpop.f32.mrf.mxu0  ;;  %v1320_v13 = vpop.f32.mrf.mxu1 }
 0x14e   : > { %985 = vst [vmem:[%s1834_s24 + $0x50] sm:$0xff] %v953_v10  ;;  %1001 = vst [vmem:[%s1834_s24 + $0xd0] sm:$0xff] %v969_v11  ;;  %v1273_v14 = vadd.f32 %v1272_v12, %v1271_v8  ;;  %v1321_v15 = vadd.f32 %v1320_v13, %v1319_v9 }
 0x14f   : > { %v1274_v16 = vpop.f32.mrf.mxu0  ;;  %v1322_v17 = vpop.f32.mrf.mxu1 }
 0x150   : > { %v954_v18 = vadd.f32 %v1273_v14, %v1828_v51  ;;  %v970_v19 = vadd.f32 %v1321_v15, %v1828_v51 }
 0x151   : > { %v1275_v20 = vpop.f32.mrf.mxu0  ;;  %v1323_v21 = vpop.f32.mrf.mxu1 }
 0x152   : > { %986 = vst [vmem:[%s1834_s24 + $0x58] sm:$0xff] %v954_v18  ;;  %1002 = vst [vmem:[%s1834_s24 + $0xd8] sm:$0xff] %v970_v19  ;;  %v1276_v22 = vadd.f32 %v1275_v20, %v1274_v16  ;;  %v1324_v23 = vadd.f32 %v1323_v21, %v1322_v17 }
 0x153   : > { %v1277_v24 = vpop.f32.mrf.mxu0  ;;  %v1325_v25 = vpop.f32.mrf.mxu1 }
 0x154   : > { %v955_v26 = vadd.f32 %v1276_v22, %v1828_v51  ;;  %v971_v27 = vadd.f32 %v1324_v23, %v1828_v51 }
 0x155   : > { %v1278_v28 = vpop.f32.mrf.mxu0  ;;  %v1326_v29 = vpop.f32.mrf.mxu1 }
 0x156   : > { %987 = vst [vmem:[%s1834_s24 + $0x60] sm:$0xff] %v955_v26  ;;  %1003 = vst [vmem:[%s1834_s24 + $0xe0] sm:$0xff] %v971_v27  ;;  %v1279_v30 = vadd.f32 %v1278_v28, %v1277_v24  ;;  %v1327_v31 = vadd.f32 %v1326_v29, %v1325_v25 }
 0x157   : > { %v1280_v32 = vpop.f32.mrf.mxu0  ;;  %v1328_v33 = vpop.f32.mrf.mxu1 }
 0x158   : > { %v956_v34 = vadd.f32 %v1279_v30, %v1828_v51  ;;  %v972_v35 = vadd.f32 %v1327_v31, %v1828_v51 }
 0x159   : > { %v1281_v36 = vpop.f32.mrf.mxu0  ;;  %v1329_v37 = vpop.f32.mrf.mxu1 }
 0x15a   : > { %988 = vst [vmem:[%s1834_s24 + $0x68] sm:$0xff] %v956_v34  ;;  %1004 = vst [vmem:[%s1834_s24 + $0xe8] sm:$0xff] %v972_v35  ;;  %v1282_v38 = vadd.f32 %v1281_v36, %v1280_v32  ;;  %v1330_v39 = vadd.f32 %v1329_v37, %v1328_v33 }
 0x15b   : > { %v1283_v40 = vpop.f32.mrf.mxu0  ;;  %v1331_v41 = vpop.f32.mrf.mxu1 }
 0x15c   : > { %v957_v42 = vadd.f32 %v1282_v38, %v1828_v51  ;;  %v973_v43 = vadd.f32 %v1330_v39, %v1828_v51 }
 0x15d   : > { %v1284_v44 = vpop.f32.mrf.mxu0  ;;  %v1332_v45 = vpop.f32.mrf.mxu1 }
 0x15e   : > { %989 = vst [vmem:[%s1834_s24 + $0x70] sm:$0xff] %v957_v42  ;;  %1005 = vst [vmem:[%s1834_s24 + $0xf0] sm:$0xff] %v973_v43  ;;  %v1285_v46 = vadd.f32 %v1284_v44, %v1283_v40  ;;  %v1333_v47 = vadd.f32 %v1332_v45, %v1331_v41 }
 0x160   : > { %v958_v48 = vadd.f32 %v1285_v46, %v1828_v51  ;;  %v974_v49 = vadd.f32 %v1333_v47, %v1828_v51 }
 0x162   : > { %990 = vst [vmem:[%s1834_s24 + $0x78] sm:$0xff] %v958_v48  ;;  %1006 = vst [vmem:[%s1834_s24 + $0xf8] sm:$0xff] %v974_v49 }
 0x163   : > { %1560 = shalt.err (!%p1557_p5)
}
 0x164   : > { %s1561_s18 = scalar_lea.hbm %s1899_s6, 4096  ;;  %s1565_s30 = scalar_lea.hbm %s1956_s3, 8192 }
 0x165   : > { %p1562_p7 = scmp.ne.s32.totalorder %s1899_s6, %s1561_s18  ;;  %p1566_p9 = scmp.lt.s32.totalorder %s1899_s6, %s1956_s3 }
 0x166   : > { %p1567_p11 = scmp.lt.s32.totalorder %s1565_s30, %s1561_s18 }
 0x167   : > { %p1563_p6 = pnand %p1562_p7, %p1749_p13 }
 0x168   : > { %p1568_p10 = por %p1567_p11, %p1566_p9 }
 0x169   : > { %p1564_p4 = pneg %p1563_p6 }
 0x16b   : > { %p1569_p1 = pnand %p1568_p10, %p1564_p4 }
 0x16d   : > { %1572 = shalt.err (!%p1569_p1)
}
 0x16e   : > { %s1640_s24 = smov 128   ;;  %s1641_s29 = smov 8  }
 0x16f   : > { %1356 = dma.vmem_to_hbm [thread:$0]  (%p1749_p13), %s1901_s4, 4096, %s1899_s6, %s1008_s15, %s1640_s24, %s1640_s24, %s1641_s29  }
 0x170 PF: > { %s1039_s21 = sand.u32 1, %s1611_s12   ;;  %p1968_p8 = scmp.ne.s32.totalorder %s1961_s23, 0 }
 0x171   : > { %p1969_p12 = scmp.ge.s32.totalorder %s1631_s17, 2  ;;  %s1040_s5 = scalar_lea.sflag [#allocation5], %s1039_s21 }
 0x173   : > { %p1367_p0 = pnand %p1969_p12, %p1968_p8 }
 0x175   : > { %p1368_p2 = pneg %p1367_p0 }
 0x177   : > { %1606 = dma.done.wait (%p1368_p2), %s1040_s5, 4096  }
 0x178   : > { %1608 = vsyncadd (%p1368_p2), %s1040_s5, 4294963200  ;;  %s20_s17 = sadd.s32 1, %s1631_s17   ;;  %s1970_s12 = smov %s1615_s13 }
 0x179   : > { %p17_p3 = scmp.ge.s32.totalorder %s20_s17, 4   ;;  %s1971_s13 = smov %s1619_s14 }
 0x17a   : > { %s1972_s14 = smov %s1758_s19  ;;  %s1973_s15 = smov %s1627_s16 }
 0x17b   : > { %s1974_s16 = smov %s1976_s28  ;;  %19 = sbr.rel (!%p17_p3) target bundleno = 7 (0x7), region = 93 }
 0x180   :  { %1045 = vsyncpa [#allocation4], 1 }
 0x181   :  { %1047 = vsyncpa [#allocation4 + $0x1], 1 }
 0x182   :  { %1048 = vsyncpa [#allocation7], 1 }
 0x183   :  { %1049 = vsyncpa [#allocation5], 1 }
 0x184   :  { %1051 = vsyncpa [#allocation5 + $0x1], 1 }

</bundles_post_ra>
